<compile_context>
chip_gen: v7x
topology: tpu7x:2x2x1
jax: 0.10.0
libtpu: 0.0.40
codegen_flags: <defaults>
</compile_context>

<pallas_src>
import functools
import math

import jax
import jax.numpy as jnp
from jax.experimental import pallas as pl
from jax.experimental.pallas import tpu as pltpu


_INV_SQRT2 = 1.0 / math.sqrt(2.0)

# Max rows per grid step.  1024x784 f32 out tile double-buffered ~= 6.4 MiB; with x
# tiles + weights the gridded path stays well under every generation's scoped VMEM.
_TILE_B_MAX = 1024
# Gridless whole-in-VMEM path only for tiny batches (keeps both v7x TCs busy otherwise).
_SINGLE_SHOT_MAX_B = 128


def _round_up(n, m):
    return ((n + m - 1) // m) * m


def _decoder_kernel(x_ref, w1_ref, b1_ref, w2_ref, b2_ref, o_ref, *, mxu_dtype):
    # Linear(d, d) + bias (f32 accumulation on the MXU).
    x = x_ref[...].astype(mxu_dtype)
    w1 = w1_ref[...].astype(mxu_dtype)
    h = jnp.dot(x, w1, preferred_element_type=jnp.float32)
    h = h + b1_ref[...]
    # Exact GELU (PyTorch nn.GELU default, erf-based); erf goes to the EUP.
    g = 0.5 * h * (1.0 + jax.lax.erf(h * jnp.float32(_INV_SQRT2)))
    # Linear(d, ch*h*w) + bias.
    out = jnp.dot(g.astype(mxu_dtype), w2_ref[...].astype(mxu_dtype),
                  preferred_element_type=jnp.float32)
    out = out + b2_ref[...]
    o_ref[...] = out.astype(o_ref.dtype)


def decoder_forward(x, w1, b1, w2, b2, ch, h, w, *, mxu_dtype=jnp.float32):
    """x: (B, d) float32. Returns (B, ch, h, w) float32 (PyTorch NCHW reshape).

    mxu_dtype=jnp.bfloat16 is an opt-in for v5e/v6e (f32 accumulation kept); it
    relaxes the 1e-5 parity with the f32 reference, so the default stays f32.
    """
    B, d = x.shape
    out_dim = ch * h * w
    assert w1.shape == (d, d) and b1.shape == (d,)
    assert w2.shape == (d, out_dim) and b2.shape == (out_dim,)

    b1_row = b1.reshape(1, d)
    b2_row = b2.reshape(1, out_dim)

    kernel = functools.partial(_decoder_kernel, mxu_dtype=mxu_dtype)

    cost = pl.CostEstimate(
        flops=2 * B * d * d + 2 * B * d * out_dim,
        transcendentals=B * d,
        bytes_accessed=4 * (B * d + d * d + d + d * out_dim + out_dim + B * out_dim),
    )

    if B <= _SINGLE_SHOT_MAX_B:
        # Everything fits in VMEM: one shot, no grid loop, no pipeline buffers.
        vmem = pltpu.MemorySpace.VMEM
        flat = pl.pallas_call(
            kernel,
            out_shape=jax.ShapeDtypeStruct((B, out_dim), jnp.float32),
            in_specs=[pl.BlockSpec(memory_space=vmem)] * 5,
            out_specs=pl.BlockSpec(memory_space=vmem),
            cost_estimate=cost,
        )(x, w1, b1_row, w2, b2_row)
    else:
        # Batch tile: big enough to amortize per-step overhead, small enough that
        # mid-size batches still yield >= 2 blocks (both v7x TensorCores get work).
        tile_b = min(_TILE_B_MAX, _round_up(pl.cdiv(B, 2), 128))
        num_tiles = pl.cdiv(B, tile_b)  # partial last block OK: rows are independent
        flat = pl.pallas_call(
            kernel,
            out_shape=jax.ShapeDtypeStruct((B, out_dim), jnp.float32),
            grid=(num_tiles,),
            in_specs=[
                pl.BlockSpec((tile_b, d), lambda i: (i, 0)),
                pl.BlockSpec((d, d), lambda i: (0, 0)),
                pl.BlockSpec((1, d), lambda i: (0, 0)),
                pl.BlockSpec((d, out_dim), lambda i: (0, 0)),
                pl.BlockSpec((1, out_dim), lambda i: (0, 0)),
            ],
            out_specs=pl.BlockSpec((tile_b, out_dim), lambda i: (i, 0)),
            compiler_params=pltpu.CompilerParams(
                # Batch tiles are independent -> shard across both TCs on v7x.
                dimension_semantics=("parallel",),
                # Headroom for the double-buffered out tile (matters on v5e's 16 MiB
                # scoped default; well under every generation's physical VMEM).
                vmem_limit_bytes=32 * 1024 * 1024,
            ),
            cost_estimate=cost,
        )(x, w1, b1_row, w2, b2_row)

    # Same as PyTorch's .reshape(B, ch, h, w); free bitcast since flat is (B, ch*h*w).
    return flat.reshape(B, ch, h, w)


def init_decoder_params(key, ch=1, h=28, w=28, d=32):
    """Deterministic init mimicking nn.Linear defaults (uniform +/- 1/sqrt(fan_in)).
    Weights stored as (in, out) for the kernel (PyTorch stores (out, in))."""
    out_dim = ch * h * w
    k1, k2, k3, k4 = jax.random.split(key, 4)
    bound = 1.0 / math.sqrt(d)
    w1 = jax.random.uniform(k1, (d, d), jnp.float32, -bound, bound)
    b1 = jax.random.uniform(k2, (d,), jnp.float32, -bound, bound)
    w2 = jax.random.uniform(k3, (d, out_dim), jnp.float32, -bound, bound)
    b2 = jax.random.uniform(k4, (out_dim,), jnp.float32, -bound, bound)
    return w1, b1, w2, b2


def decoder_reference(x, w1, b1, w2, b2, ch, h, w):
    """Pure-JAX reference for correctness check."""
    hidden = x @ w1 + b1
    hidden = jax.nn.gelu(hidden, approximate=False)
    out = hidden @ w2 + b2
    return out.reshape(x.shape[0], ch, h, w)


if __name__ == "__main__":
    ch, H, W, d = 1, 28, 28, 32

    key = jax.random.PRNGKey(0)
    kx, kp, kx2 = jax.random.split(key, 3)
    w1, b1, w2, b2 = init_decoder_params(kp, ch=ch, h=H, w=W, d=d)

    # Small batch: single-shot (gridless, whole-in-VMEM) path.
    B = 8
    x = jax.random.normal(kx, (B, d), jnp.float32)
    out = jax.block_until_ready(decoder_forward(x, w1, b1, w2, b2, ch, H, W))
    ref = decoder_reference(x, w1, b1, w2, b2, ch, H, W)
    assert out.shape == (B, ch, H, W), out.shape
    assert jnp.allclose(out, ref, atol=1e-5, rtol=1e-5), float(jnp.max(jnp.abs(out - ref)))

    # Mid-size batch: gridded path, 2 batch tiles (both v7x TCs), partial last block
    # (no batch padding, no output-feature padding, no wrapper slices).
    B2 = 300
    x2 = jax.random.normal(kx2, (B2, d), jnp.float32)
    out2 = jax.block_until_ready(decoder_forward(x2, w1, b1, w2, b2, ch, H, W))
    ref2 = decoder_reference(x2, w1, b1, w2, b2, ch, H, W)
    assert out2.shape == (B2, ch, H, W), out2.shape
    assert jnp.allclose(out2, ref2, atol=1e-5, rtol=1e-5), float(jnp.max(jnp.abs(out2 - ref2)))

    print("KERNEL_OK")
</pallas_src>

<mosaic_0001>
module attributes {stable_mosaic.version = 11 : i64} {
  func.func @_decoder_kernel(%arg0: memref<8x32xf32, #tpu.memory_space<vmem>>, %arg1: memref<32x32xf32, #tpu.memory_space<vmem>>, %arg2: memref<1x32xf32, #tpu.memory_space<vmem>>, %arg3: memref<32x784xf32, #tpu.memory_space<vmem>>, %arg4: memref<1x784xf32, #tpu.memory_space<vmem>>, %arg5: memref<8x784xf32, #tpu.memory_space<vmem>>) attributes {dimension_semantics = [], scalar_prefetch = 0 : i64, scratch_operands = 0 : i64, tpu.core_type = #tpu.core_type<tc>} {
    %c0 = arith.constant 0 : index
    %c0_0 = arith.constant 0 : index
    %0 = vector.load %arg0[%c0, %c0_0] : memref<8x32xf32, #tpu.memory_space<vmem>>, vector<8x32xf32>
    %c0_1 = arith.constant 0 : index
    %c0_2 = arith.constant 0 : index
    %1 = vector.load %arg1[%c0_1, %c0_2] : memref<32x32xf32, #tpu.memory_space<vmem>>, vector<32x32xf32>
    %cst = arith.constant dense<0.000000e+00> : vector<8x32xf32>
    %2 = tpu.matmul %0, %1, %cst {dimension_numbers = #tpu.dot_dimension_numbers<[1], [0], [0], [1], [0, 0, 1, 1], [], []>} : vector<8x32xf32>, vector<32x32xf32>, vector<8x32xf32> -> vector<8x32xf32>
    %c0_3 = arith.constant 0 : index
    %c0_4 = arith.constant 0 : index
    %3 = vector.load %arg2[%c0_3, %c0_4] : memref<1x32xf32, #tpu.memory_space<vmem>>, vector<1x32xf32>
    %4 = vector.broadcast %3 : vector<1x32xf32> to vector<8x32xf32>
    %5 = arith.addf %2, %4 : vector<8x32xf32>
    %cst_5 = arith.constant 5.000000e-01 : f32
    %6 = vector.broadcast %cst_5 : f32 to vector<8x32xf32>
    %7 = arith.mulf %6, %5 : vector<8x32xf32>
    %cst_6 = arith.constant 0.707106769 : f32
    %8 = vector.broadcast %cst_6 : f32 to vector<8x32xf32>
    %9 = arith.mulf %5, %8 : vector<8x32xf32>
    %10 = math.erf %9 : vector<8x32xf32>
    %cst_7 = arith.constant 1.000000e+00 : f32
    %11 = vector.broadcast %cst_7 : f32 to vector<8x32xf32>
    %12 = arith.addf %11, %10 : vector<8x32xf32>
    %13 = arith.mulf %7, %12 : vector<8x32xf32>
    %c0_8 = arith.constant 0 : index
    %c0_9 = arith.constant 0 : index
    %14 = vector.load %arg3[%c0_8, %c0_9] : memref<32x784xf32, #tpu.memory_space<vmem>>, vector<32x784xf32>
    %cst_10 = arith.constant dense<0.000000e+00> : vector<8x784xf32>
    %15 = tpu.matmul %13, %14, %cst_10 {dimension_numbers = #tpu.dot_dimension_numbers<[1], [0], [0], [1], [0, 0, 1, 1], [], []>} : vector<8x32xf32>, vector<32x784xf32>, vector<8x784xf32> -> vector<8x784xf32>
    %c0_11 = arith.constant 0 : index
    %c0_12 = arith.constant 0 : index
    %16 = vector.load %arg4[%c0_11, %c0_12] : memref<1x784xf32, #tpu.memory_space<vmem>>, vector<1x784xf32>
    %17 = vector.broadcast %16 : vector<1x784xf32> to vector<8x784xf32>
    %18 = arith.addf %15, %17 : vector<8x784xf32>
    %c0_13 = arith.constant 0 : index
    %c0_14 = arith.constant 0 : index
    %19 = vector.load %arg5[%c0_13, %c0_14] : memref<8x784xf32, #tpu.memory_space<vmem>>, vector<8x784xf32>
    tpu.vector_store %arg5[%c0_13, %c0_14], %18 {strides = array<i32>} : memref<8x784xf32, #tpu.memory_space<vmem>>, vector<8x784xf32>,
    return
  }
}

</mosaic_0001>

<bundles_post_ra>
// kernel: tpu_custom_call.1
= control target key start
LH: loop header
LB: loop body
LE: loop exit
PB: predicated region body
PF: predicated region fallthrough
CT: control target
= control target key end

     0   :  { %10 = vsyncpa [#allocation3], 0  ;;  %s818_s0 = inlined_call_operand.hbm [shape: f32[8,32], index: 0, kind: input, shape index: {}]   ;;  %s819_s1 = inlined_call_operand.hbm [shape: f32[32,32], index: 1, kind: input, shape index: {}]   ;;  %s820_s2 = inlined_call_operand.vmem [shape: f32[1,32], index: 2, kind: input, shape index: {}]   ;;  %s821_s3 = inlined_call_operand.hbm [shape: f32[32,784], index: 3, kind: input, shape index: {}]   ;;  %s822_s4 = inlined_call_operand.vmem [shape: f32[1,784], index: 4, kind: input, shape index: {}]   ;;  %s823_s5 = inlined_call_operand.hbm [shape: f32[8,784], index: 5, kind: output, shape index: {}]  }
   0x1   :  { %11 = vsyncpa [#allocation6], 0 }
   0x2   :  { %12 = vsyncpa [#allocation4], 0  ;;  %s707_s18 = smov [#allocation5]   ;;  %s613_s22 = scalar_lea.hbm %s819_s1, 512 }
   0x3   :  { %s28_s19 = sshll.u32 %s707_s18, 4  ;;  %p614_p0 = scmp.ne.s32.totalorder %s819_s1, %s613_s22  ;;  %s29_s19 = int_to_ptr.vmem [resolvable:$true] %s28_s19 }
   0x4   :  { %p617_p1 = scmp.lt.u32.totalorder %s613_s22, %s819_s1 }
   0x6   :  { %p619_p2 = pnand %p617_p1, %p614_p0 }
   0x8   :  { %622 = shalt.err (!%p619_p2)
}
   0x9   :  { %s623_s27 = scalar_lea.vmem %s29_s19, 512  ;;  %p628_p4 = scmp.lt.s32.totalorder %s29_s19, %s29_s19 }
   0xa   :  { %p624_p3 = scmp.ne.s32.totalorder %s29_s19, %s623_s27  ;;  %p629_p5 = scmp.lt.s32.totalorder %s623_s27, %s623_s27 }
   0xc   :  { %p630_p6 = por %p629_p5, %p628_p4 }
   0xe   :  { %p631_p7 = pnand %p630_p6, %p624_p3 }
  0x10   :  { %634 = shalt.err (!%p631_p7)
}
  0x11   :  { %s708_s28 = smov 128   ;;  %s709_s29 = smov 8  }
  0x12   :  { %34 = dma.hbm_to_vmem [thread:$0]  %s819_s1, 512, %s29_s19, [#allocation6], %s708_s28, %s708_s28, %s709_s29  }
  0x13   :  { %s710_s7 = smov [#allocation2]   ;;  %s711_s9 = smov [#allocation7]  }
  0x14   :  { %s19_s8 = sshll.u32 %s710_s7, 4  ;;  %s42_s10 = sshll.u32 %s711_s9, 4  ;;  %s20_s8 = int_to_ptr.vmem [resolvable:$true] %s19_s8  ;;  %s43_s10 = int_to_ptr.vmem [resolvable:$true] %s42_s10 }
  0x15   :  { %s635_s13 = scalar_lea.hbm %s818_s0, 128 }
  0x16   :  { %p636_p8 = scmp.ne.s32.totalorder %s818_s0, %s635_s13  ;;  %p639_p9 = scmp.lt.u32.totalorder %s635_s13, %s818_s0 }
  0x18   :  { %p641_p10 = pnand %p639_p9, %p636_p8 }
  0x1a   :  { %644 = shalt.err (!%p641_p10)
}
  0x1b   :  { %s645_s1 = scalar_lea.vmem %s20_s8, 128  ;;  %p650_p12 = scmp.lt.s32.totalorder %s20_s8, %s20_s8 }
  0x1c   :  { %p646_p11 = scmp.ne.s32.totalorder %s20_s8, %s645_s1  ;;  %p651_p13 = scmp.lt.s32.totalorder %s645_s1, %s645_s1 }
  0x1e   :  { %p652_p0 = por %p651_p13, %p650_p12 }
  0x20   :  { %p653_p1 = pnand %p652_p0, %p646_p11 }
  0x22   :  { %656 = shalt.err (!%p653_p1)
}
  0x23   :  { %22 = dma.hbm_to_vmem [thread:$0]  %s818_s0, 128, %s20_s8, [#allocation3]  }
  0x24   :  { %s657_s22 = scalar_lea.hbm %s821_s3, 3584 }
  0x25   :  { %p658_p2 = scmp.ne.s32.totalorder %s821_s3, %s657_s22  ;;  %p661_p3 = scmp.lt.u32.totalorder %s657_s22, %s821_s3 }
  0x27   :  { %p663_p4 = pnand %p661_p3, %p658_p2 }
  0x29   :  { %666 = shalt.err (!%p663_p4)
}
  0x2a   :  { %s667_s27 = scalar_lea.vmem %s43_s10, 3584  ;;  %p672_p6 = scmp.lt.s32.totalorder %s43_s10, %s43_s10 }
  0x2b   :  { %p668_p5 = scmp.ne.s32.totalorder %s43_s10, %s667_s27  ;;  %p673_p7 = scmp.lt.s32.totalorder %s667_s27, %s667_s27 }
  0x2d   :  { %p674_p8 = por %p673_p7, %p672_p6 }
  0x2f   :  { %p675_p9 = pnand %p674_p8, %p668_p5 }
  0x31   :  { %678 = shalt.err (!%p675_p9)
}
  0x32   :  { %s712_s0 = smov 896   ;;  %s713_s28 = smov 56  }
  0x33   :  { %48 = dma.hbm_to_vmem [thread:$0]  %s821_s3, 3584, %s43_s10, [#allocation6], %s712_s0, %s712_s0, %s713_s28  }
  0x34   :  { %701 = dma.done.wait [#allocation3], 128  }
  0x35   :  { %702 = vsyncadd [#allocation3], 4294967168 }
  0x36   :  { %703 = dma.done.wait [#allocation6], 4096  }
  0x37   :  { %704 = vsyncadd [#allocation6], 4294963200  ;;  %v714_v0 = vmov 0.0|0.0   ;;  %vm715_vm0 = vmmov 0   ;;  %v716_v1 = vmov 0.0   ;;  %v61_v2 = vld [vmem:[#allocation5] sm:$0xff]  ;;  %v181_v60 = vlaneseq }
  0x38   :  { %564 = vmatprep.subr.bf16.mxu0 %v714_v0  ;;  %550 = vmatprep.mubr.msk.f32.mxu0 %vm715_vm0, %v716_v1  ;;  %v62_v3 = vld [vmem:[#allocation5 + $0x8] sm:$0xff]  ;;  %v63_v4 = vld [vmem:[#allocation5 + $0x10] sm:$0xff]  ;;  %v64_v6 = vld [vmem:[#allocation5 + $0x18] sm:$0xff]  ;;  %vm72_vm1 = vcmask 261120   ;;  %vm508_vm2 = vcmask 130048  }
  0x39   :  { %283 = vmatprep.mubr.f32.mxu1 %v716_v1  ;;  %v565_v5 = vpack.c.bf16 %v62_v3, %v61_v2  ;;  %v568_v7 = vpack.c.bf16 %v64_v6, %v63_v4  ;;  %v60_v8 = vld [vmem:[#allocation2] sm:$0xff]  ;;  %v152_v9 = vld [vmem:[#allocation7 + $0x8] sm:$0xff]  ;;  %v159_v10 = vld [vmem:[#allocation7 + $0x40] sm:$0xff]  ;;  %v182_v61 = vshrl.u32 %v181_v60, 7 }
  0x3a   :  { %v154_v11 = vld [vmem:[#allocation7 + $0x18] sm:$0xff]  ;;  %v570_v12 = vpack.c.bf16 %v159_v10, %v152_v9  ;;  %v161_v13 = vld [vmem:[#allocation7 + $0x50] sm:$0xff]  ;;  %v151_v14 = vld [vmem:[#allocation7] sm:$0xff] }
  0x3b   :  { %566 = vmatpush3.bf16.msra.mxu0 %v565_v5  ;;  %v158_v15 = vld [vmem:[#allocation7 + $0x38] sm:$0xff]  ;;  %v578_v16 = vpack.c.bf16 %v161_v13, %v154_v11  ;;  %v153_v18 = vld [vmem:[#allocation7 + $0x10] sm:$0xff]  ;;  %v160_v19 = vld [vmem:[#allocation7 + $0x48] sm:$0xff]  ;;  %v183_v62 = vsub.s32 0, %v182_v61  ;;  %v191_v63 = vsub.s32 2, %v182_v61  ;;  %v195_v3 = vsub.s32 3, %v182_v61 }
  0x3c   :  { %567 = vmatprep.subr.bf16.mxu0 %v714_v0  ;;  %v572_v17 = vpack.c.bf16 %v158_v15, %v151_v14  ;;  %571 = vmatprep.subr.bf16.mxu1 %v570_v12  ;;  %v580_v20 = vpack.c.bf16 %v160_v19, %v153_v18  ;;  %v166_v21 = vld [vmem:[#allocation7 + $0x78] sm:$0xff]  ;;  %v173_v22 = vld [vmem:[#allocation7 + $0xb0] sm:$0xff]  ;;  %v168_v23 = vld [vmem:[#allocation7 + $0x88] sm:$0xff]  ;;  %v199_v13 = vsub.s32 4, %v182_v61  ;;  %v207_v14 = vsub.s32 6, %v182_v61 }
  0x3d   :  { %v574_v24 = vpack.c.bf16 %v173_v22, %v166_v21  ;;  %v175_v25 = vld [vmem:[#allocation7 + $0xc0] sm:$0xff]  ;;  %v165_v26 = vld [vmem:[#allocation7 + $0x70] sm:$0xff]  ;;  %v172_v27 = vld [vmem:[#allocation7 + $0xa8] sm:$0xff] }
  0x3e   :  { %573 = vmatpush1.bf16.msra.mxu1 %v572_v17  ;;  %v582_v28 = vpack.c.bf16 %v175_v25, %v168_v23  ;;  %v576_v29 = vpack.c.bf16 %v172_v27, %v165_v26  ;;  %v167_v30 = vld [vmem:[#allocation7 + $0x80] sm:$0xff]  ;;  %v174_v31 = vld [vmem:[#allocation7 + $0xb8] sm:$0xff]  ;;  %v156_v33 = vld [vmem:[#allocation7 + $0x28] sm:$0xff]  ;;  %v203_v17 = vsub.s32 5, %v182_v61 }
  0x3f   :  { %569 = vmatpush3.bf16.msra.mxu0 %v568_v7  ;;  %575 = vmatprep.subr.bf16.mxu1 %v574_v24  ;;  %v584_v32 = vpack.c.bf16 %v174_v31, %v167_v30  ;;  %v163_v34 = vld [vmem:[#allocation7 + $0x60] sm:$0xff]  ;;  %v526_v36 = vld [vmem:[%s820_s2] ss:$0 sm:$0xff]  ;;  %v157_v43 = vld [vmem:[#allocation7 + $0x30] sm:$0xff] }
  0x40   :  { %579 = vmatprep.subr.bf16.mxu0 %v578_v16  ;;  %v586_v35 = vpack.c.bf16 %v163_v34, %v156_v33  ;;  %v155_v41 = vld [vmem:[#allocation7 + $0x20] sm:$0xff]  ;;  %v162_v42 = vld [vmem:[#allocation7 + $0x58] sm:$0xff]  ;;  %v164_v44 = vld [vmem:[#allocation7 + $0x68] sm:$0xff] }
  0x41   :  { %v170_v46 = vld [vmem:[#allocation7 + $0x98] sm:$0xff]  ;;  %v177_v47 = vld [vmem:[#allocation7 + $0xd0] sm:$0xff]  ;;  %v588_v50 = vpack.c.bf16 %v162_v42, %v155_v41  ;;  %v595_v51 = vpack.c.bf16 %v164_v44, %v157_v43  ;;  %v176_v55 = vld [vmem:[#allocation7 + $0xc8] sm:$0xff] }
  0x42   :  { %551 = vmatmul.mubr.msk.f32.vlgmr.msra.gmra.mrb[0].mxu0 %vm72_vm1, %v60_v8  ;;  %577 = vmatpush1.bf16.msra.mxu1 %v576_v29  ;;  %v169_v52 = vld [vmem:[#allocation7 + $0x90] sm:$0xff]  ;;  %v590_v54 = vpack.c.bf16 %v177_v47, %v170_v46  ;;  %v171_v56 = vld [vmem:[#allocation7 + $0xa0] sm:$0xff]  ;;  %v178_v57 = vld [vmem:[#allocation7 + $0xd8] sm:$0xff] }
  0x43   :  { %354 = vmatprep.mubr.f32.mxu0 %v716_v1  ;;  %581 = vmatpush1.bf16.msra.mxu0 %v580_v20  ;;  %v592_v58 = vpack.c.bf16 %v176_v55, %v169_v52  ;;  %v598_v59 = vpack.c.bf16 %v178_v57, %v171_v56  ;;  %v179_v2 = vld [vmem:[%s822_s4] sm:$0x7f]  ;;  %s717_s4 = smov [#allocation8]  }
  0x44   :  { %583 = vmatprep.subr.bf16.mxu0 %v582_v28  ;;  %587 = vmatprep.subr.bf16.mxu1 %v586_v35  ;;  %v184_v4 = vrot.slane %v179_v2, %v183_v62  ;;  %v192_v5 = vrot.slane %v179_v2, %v191_v63  ;;  %v200_v18 = vrot.slane %v179_v2, %v199_v13  ;;  %s516_s8 = sshll.u32 %s717_s4, 4  ;;  %s517_s8 = int_to_ptr.vmem [resolvable:$true] %s516_s8 }
  0x45   :  { %v208_v19 = vrot.slane %v179_v2, %v207_v14  ;;  %v204_v20 = vrot.slane %v179_v2, %v203_v17  ;;  %s679_s9 = scalar_lea.vmem %s517_s8, 896  ;;  %p684_p11 = scmp.lt.s32.totalorder %s517_s8, %s517_s8 }
  0x46   :  { %p680_p10 = scmp.ne.s32.totalorder %s517_s8, %s679_s9  ;;  %p685_p12 = scmp.lt.s32.totalorder %s679_s9, %s679_s9 }
  0x47   :  { %585 = vmatpush1.bf16.msra.mxu0 %v584_v32 }
  0x48   :  { %594 = vmatprep.subr.bf16.mxu0 %v714_v0  ;;  %p686_p13 = por %p685_p12, %p684_p11 }
  0x4a   :  { %p687_p0 = pnand %p686_p13, %p680_p10 }
 0x115   :  { %v142_v37 = vpop.f32.mrb[0].mxu0 }
 0x116   :  { %v143_v38 = vadd.f32 %v526_v36, %v142_v37  ;;  %v552_v39 = vpop.f32.mrb[1].mxu0 }
 0x118   :  { %v147_v40 = vmul.f32 0.70710677, %v143_v38  ;;  %v146_v48 = vmul.f32 0.5, %v143_v38 }
 0x11a   :  { %611 = verf.f32 %v147_v40 }
 0x124   :  { %v612_v45 = vpop.eup %611 }
 0x125   :  { %v149_v49 = vadd.f32 1.0, %v612_v45 }
 0x127   :  { %v150_v53 = vmul.f32 %v149_v49, %v146_v48 }
 0x129   :  { %528 = vmatmul.mubr.msk.f32.vlgmr.msra.gmra.mrb[0].mxu1 %vm72_vm1, %v150_v53  ;;  %529 = vmatmul.mubr.msk.f32.vlgmr.msra.gmra.mrb[2].mxu0 %vm72_vm1, %v150_v53 }
 0x12a   :  { %589 = vmatpush1.bf16.msra.mxu1 %v588_v50  ;;  %596 = vmatpush3.bf16.msra.mxu0 %v595_v51 }
 0x12b   :  { %591 = vmatprep.subr.bf16.mxu1 %v590_v54  ;;  %597 = vmatprep.subr.bf16.mxu0 %v714_v0  ;;  %v187_v0 = vsub.s32 1, %v182_v61 }
 0x12c   :  { %425 = vmatprep.mubr.f32.mxu1 %v716_v1  ;;  %561 = vmatprep.mubr.msk.f32.mxu0 %vm715_vm0, %v716_v1  ;;  %v196_v1 = vrot.slane %v179_v2, %v195_v3 }
 0x12d   :  { %v188_v6 = vrot.slane %v179_v2, %v187_v0 }
 0x12e   :  { %593 = vmatpush1.bf16.msra.mxu1 %v592_v58  ;;  %599 = vmatpush3.bf16.msra.mxu0 %v598_v59 }
 0x131   :  { %530 = vmatmul.mubr.msk.f32.vlgmr.msra.gmra.mrb[2].mxu1 %vm72_vm1, %v150_v53  ;;  %562 = vmatmul.mubr.msk.f32.vlgmr.msra.gmra.mrb[4].mxu0 %vm72_vm1, %v150_v53 }
 0x1fc   :  { %v285_v7 = vpop.f32.mrb[0].mxu1  ;;  %v356_v8 = vpop.f32.mrb[2].mxu0 }
 0x1fd   :  { %v286_v9 = vadd.f32 %v285_v7, %v184_v4  ;;  %v357_v10 = vadd.f32 %v356_v8, %v192_v5  ;;  %v287_v11 = vpop.f32.mrb[1].mxu1  ;;  %v358_v12 = vpop.f32.mrb[3].mxu0 }
 0x1fe   :  { %v288_v15 = vadd.f32 %v287_v11, %v188_v6  ;;  %v359_v16 = vadd.f32 %v358_v12, %v196_v1 }
 0x1ff   :  { %502 = vst [vmem:[#allocation8] sm:$0xff] %v286_v9  ;;  %504 = vst [vmem:[#allocation8 + $0x10] sm:$0xff] %v357_v10 }
 0x200   :  { %503 = vst [vmem:[#allocation8 + $0x8] sm:$0xff] %v288_v15  ;;  %505 = vst [vmem:[#allocation8 + $0x18] sm:$0xff] %v359_v16 }
 0x204   :  { %v427_v21 = vpop.f32.mrb[2].mxu1  ;;  %v498_v22 = vpop.f32.mrb[4].mxu0 }
 0x205   :  { %v428_v23 = vadd.f32 %v427_v21, %v200_v18  ;;  %v499_v24 = vadd.f32 %v498_v22, %v208_v19  ;;  %v429_v25 = vpop.f32.mrb[3].mxu1  ;;  %v563_v26 = vpop.f32.mrb[5].mxu0 }
 0x206   :  { %v430_v27 = vadd.f32 %v429_v25, %v204_v20 }
 0x207   :  { %506 = vst [vmem:[#allocation8 + $0x20] sm:$0xff] %v428_v23  ;;  %509 = vst.msk [vmem:[#allocation8 + $0x30] sm:$0xff] %vm508_vm2, %v499_v24 }
 0x208   :  { %507 = vst [vmem:[#allocation8 + $0x28] sm:$0xff] %v430_v27 }
 0x209   :  { %690 = shalt.err (!%p687_p0)
}
 0x20a   :  { %s691_s12 = scalar_lea.hbm %s823_s5, 896 }
 0x20b   :  { %p692_p1 = scmp.ne.s32.totalorder %s823_s5, %s691_s12  ;;  %p695_p2 = scmp.lt.u32.totalorder %s691_s12, %s823_s5 }
 0x20d   :  { %p697_p3 = pnand %p695_p2, %p692_p1 }
 0x20f   :  { %700 = shalt.err (!%p697_p3)
}
 0x210   :  { %519 = dma.vmem_to_hbm [thread:$0]  %s517_s8, 896, %s823_s5, [#allocation4]  }
 0x211   :  { %705 = dma.done.wait [#allocation4], 896  }
 0x212   :  { %706 = vsyncadd [#allocation4], 4294966400 }
 0x213   :  { %523 = vsyncpa [#allocation3], 1 }
 0x214   :  { %524 = vsyncpa [#allocation6], 1 }
 0x215   :  { %525 = vsyncpa [#allocation4], 1 }

</bundles_post_ra>
